<compile_context>
chip_gen: v7x
topology: tpu7x:2x2x1
jax: 0.10.0
libtpu: 0.0.40
codegen_flags: <defaults>
</compile_context>

<pallas_src>
import jax
import jax.numpy as jnp
from jax.experimental import pallas as pl
from jax.experimental.pallas import tpu as pltpu


def _round_up(x, m):
    return (x + m - 1) // m * m


def _cdiv(a, b):
    return -(-a // b)


def _vmem_budget_bytes():
    """Generation-aware VMEM budget with ~25% headroom."""
    try:
        cap = int(pltpu.get_tpu_info().vmem_capacity_bytes)
    except Exception:
        kind = ""
        try:
            kind = jax.devices()[0].device_kind.lower()
        except Exception:
            pass
        if "v7" in kind:
            cap = 64 << 20          # v7x: 64 MiB / TensorCore
        elif any(v in kind for v in ("v4", "v5", "v6")):
            cap = 128 << 20         # v4/v5e/v6e: 128 MiB
        else:
            cap = 64 << 20          # unknown: conservative
    return min(cap - cap // 4, 100 << 20)


def _choose_tiles(B, in_dim, hid, out, x_itemsize, out_itemsize, budget, block_b):
    """Pick (tb, n_b, th, n_h) so the working set fits the VMEM budget."""
    # 1) hidden dim: keep weights fully resident (single-buffered) if they fit
    #    in ~1/3 of the budget, otherwise stream double-buffered hid tiles.
    resident_w = 2 * hid * (in_dim + out) + 4 * hid + 4 * out   # bf16 W, f32 b
    if resident_w <= budget // 3:
        th = hid
        w_bytes = resident_w
    else:
        per_th = 2 * (2 * (in_dim + out) + 4)   # 2 buffers: bf16 W1/W2 cols + f32 b1
        raw = (budget // 3) // max(per_th, 1)
        th = min(raw, _round_up(hid, 128))
        th = max(128, (th // 128) * 128)
        w_bytes = per_th * th + 8 * out
    n_h = _cdiv(hid, th)

    # 2) batch tile from the remaining budget.
    per_row = (2 * in_dim * x_itemsize      # x, double-buffered
               + 2 * out * out_itemsize     # output, double-buffered
               + 4 * out                    # f32 accumulator scratch
               + 6 * th)                    # h (f32) + h (bf16) temporaries
    tb_cap = max((budget - w_bytes) // max(per_row, 1), 8)
    tb = min(block_b, tb_cap, _round_up(B, 8))
    tb = max(8, (tb // 8) * 8)

    # Balance the tail: padded rows become O(8/B) instead of O(tb/B).
    n_b = _cdiv(B, tb)
    tb = max(8, _round_up(_cdiv(B, n_b), 8))
    n_b = _cdiv(B, tb)

    # Give v7x's two TensorCores work when the batch allows it.
    if n_b < 2 and B >= 16:
        tb = max(8, _round_up(_cdiv(B, 2), 8))
        n_b = _cdiv(B, tb)
    return tb, n_b, th, n_h


def decoder_kernel(x_ref, w1_ref, b1_ref, w2_ref, b2_ref, o_ref, acc_ref):
    # x: [tb, in] (orig dtype), w1: [in, th] (bf16), b1: [1, th] (f32),
    # w2: [th, out] (bf16), b2: [1, out] (f32), o: [tb, out], acc: [tb, out] f32
    j = pl.program_id(1)

    @pl.when(j == 0)
    def _():
        acc_ref[...] = jnp.zeros_like(acc_ref)

    xb = x_ref[...].astype(w1_ref.dtype)                       # cast on VPU, in-kernel
    h = jnp.dot(xb, w1_ref[...], preferred_element_type=jnp.float32)
    h = jnp.maximum(h + b1_ref[...], 0.0)                      # bias + ReLU in f32
    acc_ref[...] += jnp.dot(h.astype(w2_ref.dtype), w2_ref[...],
                            preferred_element_type=jnp.float32)

    @pl.when(j == pl.num_programs(1) - 1)
    def _():
        o_ref[...] = (acc_ref[...] + b2_ref[...]).astype(o_ref.dtype)


def decoder_forward(x, w1, b1, w2, b2, *, block_b=512,
                    compute_dtype=jnp.bfloat16, out_dtype=None):
    """x: [B, in_dim]; w1: [in_dim, hid]; b1: [hid]; w2: [hid, out]; b2: [out].

    Weights are the pre-transposed ([in, out]) form of PyTorch's nn.Linear
    weights, so the math is exactly relu(x @ W1 + b1) @ W2 + b2.
    Set out_dtype=jnp.bfloat16 to halve output HBM writeback if the consumer allows.
    """
    B, in_dim = x.shape
    hid = w1.shape[1]
    out = w2.shape[1]
    out_dtype = x.dtype if out_dtype is None else out_dtype

    budget = _vmem_budget_bytes()
    tb, n_b, th, n_h = _choose_tiles(
        B, in_dim, hid, out,
        jnp.dtype(x.dtype).itemsize, jnp.dtype(out_dtype).itemsize,
        budget, block_b)

    # One-time (small) weight/bias prep; activations are NOT touched here.
    w1c = w1.astype(compute_dtype)
    w2c = w2.astype(compute_dtype)
    b1c = b1.astype(jnp.float32).reshape(1, hid)
    b2c = b2.astype(jnp.float32).reshape(1, out)
    hid_p = th * n_h
    if hid_p != hid:
        # Zero-pad hid so it divides into th tiles; padded columns give
        # relu(0 + 0) == 0 and contribute nothing to the second matmul.
        w1c = jnp.pad(w1c, ((0, 0), (0, hid_p - hid)))
        w2c = jnp.pad(w2c, ((0, hid_p - hid), (0, 0)))
        b1c = jnp.pad(b1c, ((0, 0), (0, hid_p - hid)))

    resident = pl.Buffered(1)           # constant index_map -> 1 buffer is enough
    w_mode = resident if n_h == 1 else pl.Buffered(2)

    cost = pl.CostEstimate(
        flops=2 * B * hid * (in_dim + out),
        transcendentals=0,
        bytes_accessed=(B * in_dim * jnp.dtype(x.dtype).itemsize
                        + (w1c.size + w2c.size) * jnp.dtype(compute_dtype).itemsize
                        + (b1c.size + b2c.size) * 4
                        + B * out * jnp.dtype(out_dtype).itemsize),
    )

    y = pl.pallas_call(
        decoder_kernel,
        out_shape=jax.ShapeDtypeStruct((B, out), out_dtype),
        grid=(n_b, n_h),
        in_specs=[
            pl.BlockSpec((tb, in_dim), lambda i, j: (i, 0)),                        # activations stream
            pl.BlockSpec((in_dim, th), lambda i, j: (0, j), pipeline_mode=w_mode),  # W1 column-tiles
            pl.BlockSpec((1, th), lambda i, j: (0, j), pipeline_mode=w_mode),       # b1 tiles
            pl.BlockSpec((th, out), lambda i, j: (j, 0), pipeline_mode=w_mode),     # W2 row-tiles
            pl.BlockSpec((1, out), lambda i, j: (0, 0), pipeline_mode=resident),    # b2 resident
        ],
        out_specs=pl.BlockSpec((tb, out), lambda i, j: (i, 0)),
        scratch_shapes=[pltpu.VMEM((tb, out), jnp.float32)],
        compiler_params=pltpu.CompilerParams(
            dimension_semantics=("parallel", "arbitrary"),
            vmem_limit_bytes=budget,
        ),
        cost_estimate=cost,
    )(x, w1c, b1c, w2c, b2c)

    return y


if __name__ == "__main__":
    # Small shapes consistent with the module's forward:
    #   relu(x @ W1 + b1) @ W2 + b2
    batch, in_dim, hid_dim, out_dim = 8, 32, 64, 16

    key = jax.random.PRNGKey(0)
    kx, kw1, kb1, kw2, kb2 = jax.random.split(key, 5)

    x = jax.random.normal(kx, (batch, in_dim), dtype=jnp.float32)
    # PyTorch Linear weight is [out, in]; we store the transposed [in, out]
    # form used by the kernel directly.
    w1 = jax.random.normal(kw1, (in_dim, hid_dim), dtype=jnp.float32) * 0.1
    b1 = jax.random.normal(kb1, (hid_dim,), dtype=jnp.float32) * 0.1
    w2 = jax.random.normal(kw2, (hid_dim, out_dim), dtype=jnp.float32) * 0.1
    b2 = jax.random.normal(kb2, (out_dim,), dtype=jnp.float32) * 0.1

    y = decoder_forward(x, w1, b1, w2, b2)
    y = jax.block_until_ready(y)

    # Reference with matched bf16 MXU inputs, f32 accumulation and f32 epilogue.
    cd = jnp.bfloat16
    h_ref = jnp.maximum(
        jnp.dot(x.astype(cd), w1.astype(cd),
                preferred_element_type=jnp.float32) + b1, 0.0)
    ref = jnp.dot(h_ref.astype(cd), w2.astype(cd),
                  preferred_element_type=jnp.float32) + b2

    assert y.shape == (batch, out_dim)
    assert jnp.allclose(y, ref, atol=1e-2, rtol=1e-2), float(
        jnp.max(jnp.abs(y - ref)))

    print("KERNEL_OK")
</pallas_src>

<mosaic_0001>
module attributes {stable_mosaic.version = 11 : i64} {
  func.func @decoder_kernel(%arg0: i32, %arg1: i32, %arg2: memref<8x32xf32, #tpu.memory_space<vmem>>, %arg3: memref<32x64xbf16, #tpu.memory_space<vmem>>, %arg4: memref<1x64xf32, #tpu.memory_space<vmem>>, %arg5: memref<64x16xbf16, #tpu.memory_space<vmem>>, %arg6: memref<1x16xf32, #tpu.memory_space<vmem>>, %arg7: memref<8x16xf32, #tpu.memory_space<vmem>>, %arg8: memref<8x16xf32, #tpu.memory_space<vmem>>) attributes {dimension_semantics = [#tpu.dimension_semantics<parallel>, #tpu.dimension_semantics<arbitrary>], iteration_bounds = array<i64: 1, 1>, scalar_prefetch = 0 : i64, scratch_operands = 1 : i64, tpu.core_type = #tpu.core_type<tc>, window_params = [{transform_indices = @transform_0, window_bounds = array<i64: 8, 32>}, {pipeline_mode = #tpu.pipeline_mode<synchronous>, transform_indices = @transform_1, window_bounds = array<i64: 32, 64>}, {pipeline_mode = #tpu.pipeline_mode<synchronous>, transform_indices = @transform_2, window_bounds = array<i64: 1, 64>}, {pipeline_mode = #tpu.pipeline_mode<synchronous>, transform_indices = @transform_3, window_bounds = array<i64: 64, 16>}, {pipeline_mode = #tpu.pipeline_mode<synchronous>, transform_indices = @transform_4, window_bounds = array<i64: 1, 16>}, {transform_indices = @transform_5, window_bounds = array<i64: 8, 16>}]} {
    %c0_i32 = arith.constant 0 : i32
    %0 = arith.cmpi eq, %arg1, %c0_i32 : i32
    %1 = arith.extui %0 : i1 to i32
    %c0_i32_0 = arith.constant 0 : i32
    %2 = arith.cmpi ne, %1, %c0_i32_0 : i32
    scf.if %2 {
      %cst_16 = arith.constant 0.000000e+00 : f32
      %21 = vector.broadcast %cst_16 : f32 to vector<8x16xf32>
      %c0_17 = arith.constant 0 : index
      %c0_18 = arith.constant 0 : index
      %22 = vector.load %arg8[%c0_17, %c0_18] : memref<8x16xf32, #tpu.memory_space<vmem>>, vector<8x16xf32>
      tpu.vector_store %arg8[%c0_17, %c0_18], %21 {strides = array<i32>} : memref<8x16xf32, #tpu.memory_space<vmem>>, vector<8x16xf32>,
    } else {
    }
    %c0 = arith.constant 0 : index
    %c0_1 = arith.constant 0 : index
    %3 = vector.load %arg2[%c0, %c0_1] : memref<8x32xf32, #tpu.memory_space<vmem>>, vector<8x32xf32>
    %4 = arith.truncf %3 : vector<8x32xf32> to vector<8x32xbf16>
    %c0_2 = arith.constant 0 : index
    %c0_3 = arith.constant 0 : index
    %5 = vector.load %arg3[%c0_2, %c0_3] : memref<32x64xbf16, #tpu.memory_space<vmem>>, vector<32x64xbf16>
    %cst = arith.constant dense<0.000000e+00> : vector<8x64xf32>
    %6 = tpu.matmul %4, %5, %cst {dimension_numbers = #tpu.dot_dimension_numbers<[1], [0], [0], [1], [0, 0, 1, 1], [], []>} : vector<8x32xbf16>, vector<32x64xbf16>, vector<8x64xf32> -> vector<8x64xf32>
    %c0_4 = arith.constant 0 : index
    %c0_5 = arith.constant 0 : index
    %7 = vector.load %arg4[%c0_4, %c0_5] : memref<1x64xf32, #tpu.memory_space<vmem>>, vector<1x64xf32>
    %8 = vector.broadcast %7 : vector<1x64xf32> to vector<8x64xf32>
    %9 = arith.addf %6, %8 : vector<8x64xf32>
    %cst_6 = arith.constant 0.000000e+00 : f32
    %10 = vector.broadcast %cst_6 : f32 to vector<8x64xf32>
    %11 = arith.maximumf %9, %10 : vector<8x64xf32>
    %c0_7 = arith.constant 0 : index
    %c0_8 = arith.constant 0 : index
    %12 = vector.load %arg8[%c0_7, %c0_8] : memref<8x16xf32, #tpu.memory_space<vmem>>, vector<8x16xf32>
    %13 = arith.truncf %11 : vector<8x64xf32> to vector<8x64xbf16>
    %c0_9 = arith.constant 0 : index
    %c0_10 = arith.constant 0 : index
    %14 = vector.load %arg5[%c0_9, %c0_10] : memref<64x16xbf16, #tpu.memory_space<vmem>>, vector<64x16xbf16>
    %cst_11 = arith.constant dense<0.000000e+00> : vector<8x16xf32>
    %15 = tpu.matmul %13, %14, %cst_11 {dimension_numbers = #tpu.dot_dimension_numbers<[1], [0], [0], [1], [0, 0, 1, 1], [], []>} : vector<8x64xbf16>, vector<64x16xbf16>, vector<8x16xf32> -> vector<8x16xf32>
    %16 = arith.addf %12, %15 : vector<8x16xf32>
    %c0_12 = arith.constant 0 : index
    %c0_13 = arith.constant 0 : index
    %17 = vector.load %arg8[%c0_12, %c0_13] : memref<8x16xf32, #tpu.memory_space<vmem>>, vector<8x16xf32>
    tpu.vector_store %arg8[%c0_12, %c0_13], %16 {strides = array<i32>} : memref<8x16xf32, #tpu.memory_space<vmem>>, vector<8x16xf32>,
    %c0_i32_14 = arith.constant 0 : i32
    %18 = arith.cmpi eq, %arg1, %c0_i32_14 : i32
    %19 = arith.extui %18 : i1 to i32
    %c0_i32_15 = arith.constant 0 : i32
    %20 = arith.cmpi ne, %19, %c0_i32_15 : i32
    scf.if %20 {
      %c0_16 = arith.constant 0 : index
      %c0_17 = arith.constant 0 : index
      %21 = vector.load %arg8[%c0_16, %c0_17] : memref<8x16xf32, #tpu.memory_space<vmem>>, vector<8x16xf32>
      %c0_18 = arith.constant 0 : index
      %c0_19 = arith.constant 0 : index
      %22 = vector.load %arg6[%c0_18, %c0_19] : memref<1x16xf32, #tpu.memory_space<vmem>>, vector<1x16xf32>
      %23 = vector.broadcast %22 : vector<1x16xf32> to vector<8x16xf32>
      %24 = arith.addf %21, %23 : vector<8x16xf32>
      %c0_20 = arith.constant 0 : index
      %c0_21 = arith.constant 0 : index
      %25 = vector.load %arg7[%c0_20, %c0_21] : memref<8x16xf32, #tpu.memory_space<vmem>>, vector<8x16xf32>
      tpu.vector_store %arg7[%c0_20, %c0_21], %24 {strides = array<i32>} : memref<8x16xf32, #tpu.memory_space<vmem>>, vector<8x16xf32>,
    } else {
    }
    return
  }
  func.func @transform_0(%arg0: i32, %arg1: i32) -> (i32, i32) {
    %c0_i32 = arith.constant 0 : i32
    %c0_i32_0 = arith.constant 0 : i32
    return %arg0, %c0_i32 : i32, i32
  }
  func.func @transform_1(%arg0: i32, %arg1: i32) -> (i32, i32) {
    %c0_i32 = arith.constant 0 : i32
    %c0_i32_0 = arith.constant 0 : i32
    return %c0_i32, %arg1 : i32, i32
  }
  func.func @transform_2(%arg0: i32, %arg1: i32) -> (i32, i32) {
    %c0_i32 = arith.constant 0 : i32
    %c0_i32_0 = arith.constant 0 : i32
    return %c0_i32, %arg1 : i32, i32
  }
  func.func @transform_3(%arg0: i32, %arg1: i32) -> (i32, i32) {
    %c0_i32 = arith.constant 0 : i32
    %c0_i32_0 = arith.constant 0 : i32
    return %arg1, %c0_i32 : i32, i32
  }
  func.func @transform_4(%arg0: i32, %arg1: i32) -> (i32, i32) {
    %c0_i32 = arith.constant 0 : i32
    %c0_i32_0 = arith.constant 0 : i32
    %c0_i32_1 = arith.constant 0 : i32
    return %c0_i32, %c0_i32_0 : i32, i32
  }
  func.func @transform_5(%arg0: i32, %arg1: i32) -> (i32, i32) {
    %c0_i32 = arith.constant 0 : i32
    %c0_i32_0 = arith.constant 0 : i32
    return %arg0, %c0_i32 : i32, i32
  }
}

</mosaic_0001>

<bundles_post_ra>
// kernel: tpu_custom_call.1
= control target key start
LH: loop header
LB: loop body
LE: loop exit
PB: predicated region body
PF: predicated region fallthrough
CT: control target
= control target key end

     0   :  { %v277_v1 = vmov 0.0   ;;  %vm278_vm0 = vmmov 0   ;;  %vm53_vm1 = vcmask 261120   ;;  %s352_s0 = inlined_call_operand.vmem [shape: f32[8,32], index: 0, kind: input, shape index: {}]   ;;  %s353_s1 = inlined_call_operand.vmem [shape: bf16[32,64], index: 1, kind: input, shape index: {}]   ;;  %s354_s2 = inlined_call_operand.vmem [shape: f32[1,64], index: 2, kind: input, shape index: {}]   ;;  %s355_s3 = inlined_call_operand.vmem [shape: bf16[64,16], index: 3, kind: input, shape index: {}]   ;;  %s356_s4 = inlined_call_operand.vmem [shape: f32[1,16], index: 4, kind: input, shape index: {}]   ;;  %s357_s5 = inlined_call_operand.hbm [shape: f32[8,16], index: 5, kind: output, shape index: {}]  }
   0x1   :  { %v247_v0 = vld [vmem:[%s353_s1] sm:$0xff]   ;;  %224 = vmatprep.subr.bf16.mxu0 %v277_v1  ;;  %v248_v2 = vld [vmem:[%s353_s1 + $0x8] sm:$0xff]   ;;  %232 = vmatprep.subr.bf16.mxu1 %v277_v1 }
   0x2   :  { %225 = vmatpush3.bf16.msra.mxu0 %v247_v0  ;;  %228 = vmatprep.mubr.msk.bf16.mxu0 %vm278_vm0, %v277_v1  ;;  %v28_v3 = vld [vmem:[%s352_s0] sm:$0xff]  ;;  %v250_v5 = vld [vmem:[%s355_s3 + $0x8] sm:$0xff]  }
   0x3   :  { %226 = vmatprep.subr.bf16.mxu0 %v277_v1  ;;  %v249_v4 = vld [vmem:[%s355_s3] sm:$0xff]   ;;  %240 = vmatprep.mubr.msk.bf16.mxu1 %vm278_vm0, %v277_v1  ;;  %v29_v6 = vpack.c.bf16 %v28_v3, %v28_v3 }
   0x4   :  { %233 = vmatpush3.bf16.msra.mxu1 %v249_v4 }
   0x5   :  { %234 = vmatprep.subr.bf16.mxu1 %v277_v1 }
   0x6   :  { %227 = vmatpush3.bf16.msra.mxu0 %v248_v2 }
   0x7   :  { %10 = vsyncpa [#allocation4], 0  ;;  %v251_v7 = vld [vmem:[%s355_s3 + $0x10] sm:$0xff]   ;;  %v252_v8 = vld [vmem:[%s355_s3 + $0x18] sm:$0xff]   ;;  %vm26_vm2 = vcmask 130048   ;;  %vm132_vm3 = vcmask 523264  }
   0x8   :  { %235 = vmatpush3.bf16.msra.mxu1 %v250_v5  ;;  %27 = vst.msk [vmem:[#allocation2] sm:$0xff] %vm26_vm2, %v277_v1  ;;  %v206_v9 = vld [vmem:[%s354_s2] ss:$0 sm:$0xff]  ;;  %s279_s2 = smov [#allocation3]  }
   0x9   :  { %229 = vmatmul.mubr.msk.bf16.vlgmr.msra.gmra.mrb[0].mxu0 %vm53_vm1, %v29_v6  ;;  %236 = vmatprep.subr.bf16.mxu1 %v277_v1  ;;  %v215_v23 = vld [vmem:[%s356_s4] ss:$0 sm:$0xff]  ;;  %s198_s8 = sshll.u32 %s279_s2, 4  ;;  %s199_s8 = int_to_ptr.vmem [resolvable:$true] %s198_s8 }
   0xa   :  { %s253_s9 = scalar_lea.vmem %s199_s8, 128  ;;  %p258_p1 = scmp.lt.s32.totalorder %s199_s8, %s199_s8 }
   0xb   :  { %p254_p0 = scmp.ne.s32.totalorder %s199_s8, %s253_s9  ;;  %p259_p2 = scmp.lt.s32.totalorder %s253_s9, %s253_s9 }
   0xc   :  { %237 = vmatpush3.bf16.msra.mxu1 %v251_v7 }
   0xd   :  { %238 = vmatprep.subr.bf16.mxu1 %v277_v1  ;;  %p260_p3 = por %p259_p2, %p258_p1 }
   0xf   :  { %v98_v17 = vld [vmem:[#allocation2] sm:$0xff]  ;;  %p261_p4 = pnand %p260_p3, %p254_p0 }
  0x10   :  { %239 = vmatpush3.bf16.msra.mxu1 %v252_v8 }
  0xdc   :  { %v91_v10 = vpop.f32.mrb[0].mxu0 }
  0xdd   :  { %v92_v11 = vadd.f32 %v206_v9, %v91_v10  ;;  %v230_v12 = vpop.f32.mrb[1].mxu0 }
  0xde   :  { %v94_v13 = vpop.f32.mrb[2].mxu0 }
  0xdf   :  { %v97_v14 = vmax.f32 %v92_v11, 0.0  ;;  %v231_v15 = vpop.f32.mrb[3].mxu0 }
  0xe1   :  { %v99_v16 = vpack.c.bf16 %v97_v14, %v97_v14 }
  0xe3   :  { %241 = vmatmul.mubr.msk.bf16.vlgmr.msra.gmra.mrb[0].mxu1 %vm132_vm3, %v99_v16 }
 0x1b6   :  { %v170_v18 = vpop.f32.mrb[0].mxu1 }
 0x1b7   :  { %v176_v19 = vadd.f32 %v170_v18, %v98_v17  ;;  %v242_v20 = vpop.f32.mrb[1].mxu1 }
 0x1b8   :  { %v173_v21 = vpop.f32.mrb[2].mxu1 }
 0x1b9   :  { %178 = vst.msk [vmem:[#allocation2] sm:$0xff] %vm26_vm2, %v176_v19  ;;  %v243_v22 = vpop.f32.mrb[3].mxu1 }
 0x1c0   :  { %v182_v24 = vld [vmem:[#allocation2] sm:$0xff] }
 0x1c1   :  { %v190_v25 = vadd.f32 %v215_v23, %v182_v24 }
 0x1c3   :  { %191 = vst.msk [vmem:[#allocation3] sm:$0xff] %vm26_vm2, %v190_v25 }
 0x1c4   :  { %264 = shalt.err (!%p261_p4)
}
 0x1c5   :  { %s265_s12 = scalar_lea.hbm %s357_s5, 128 }
 0x1c6   :  { %p266_p5 = scmp.ne.s32.totalorder %s357_s5, %s265_s12  ;;  %p269_p6 = scmp.lt.u32.totalorder %s265_s12, %s357_s5 }
 0x1c8   :  { %p271_p7 = pnand %p269_p6, %p266_p5 }
 0x1ca   :  { %274 = shalt.err (!%p271_p7)
}
 0x1cb   :  { %201 = dma.vmem_to_hbm [thread:$0]  %s199_s8, 128, %s357_s5, [#allocation4]  }
 0x1cc   :  { %275 = dma.done.wait [#allocation4], 128  }
 0x1cd   :  { %276 = vsyncadd [#allocation4], 4294967168 }
 0x1ce   :  { %205 = vsyncpa [#allocation4], 1 }

</bundles_post_ra>
